<compile_context>
chip_gen: v5e
topology: v5e:2x2
jax: 0.10.0
libtpu: 0.0.40
codegen_flags: <defaults>
</compile_context>

<pallas_src>
import functools

import jax
import jax.numpy as jnp
from jax.experimental import pallas as pl
from jax.experimental.pallas import tpu as pltpu


def _round_up(n, m):
    return ((n + m - 1) // m) * m


def _mlp_kernel(x_ref, w1_ref, b1_ref, w2_ref, b2_ref, w3_ref, b3_ref, o_ref):
    # fc1 + relu (MXU matmul, f32 accumulate; bias add / relu on VPU in f32)
    x = x_ref[...]
    h1 = jnp.maximum(
        jnp.dot(x, w1_ref[...], preferred_element_type=jnp.float32) + b1_ref[...],
        0.0)
    # fc2 + relu
    h2 = jnp.maximum(
        jnp.dot(h1, w2_ref[...], preferred_element_type=jnp.float32) + b2_ref[...],
        0.0)
    # fc3 (no activation) -> narrow (TM, 2) store (masked vst; tiny vs the
    # 64x HBM-byte saving over a 128-lane padded output)
    o_ref[...] = (jnp.dot(h2, w3_ref[...], preferred_element_type=jnp.float32)
                  + b3_ref[...]).astype(o_ref.dtype)


def _pick_tile(B, tm):
    """Batch tile: multiple of 8 sublanes, capped at the (padded) batch,
    and split so the grid has >=2 steps whenever the batch allows it
    (v7x megacore sharding via dimension_semantics=("parallel",))."""
    tm = max(8, _round_up(int(tm), 8))
    TM = min(tm, _round_up(B, 8))
    Bp = _round_up(B, TM)
    if Bp // TM < 2 and B > 8:
        TM = max(8, _round_up((Bp + 1) // 2, 8))
        Bp = _round_up(B, TM)
    return TM, Bp


@functools.partial(jax.jit, static_argnames=("tm",))
def trading_nn_forward(x, params, tm=1024):
    """x: (B, input_size) float32. params: dict of weights/biases.

    Returns (B, 2) float32, identical math to the PyTorch TradingNN forward.
    """
    w1, b1, w2, b2, w3, b3 = (params["w1"], params["b1"], params["w2"],
                              params["b2"], params["w3"], params["b3"])
    B, F = x.shape
    out_dim = w3.shape[1]  # 2

    TM, Bp = _pick_tile(B, tm)
    if Bp != B:
        x = jnp.pad(x, ((0, Bp - B), (0, 0)))
    grid = (Bp // TM,)

    out = pl.pallas_call(
        _mlp_kernel,
        out_shape=jax.ShapeDtypeStruct((Bp, out_dim), jnp.float32),
        grid=grid,
        in_specs=[
            # x tile marches down the batch axis (pipelined).
            pl.BlockSpec((TM, F), lambda i: (i, 0)),
            # Weights / biases: constant index_map -> fetched once, VMEM-resident.
            pl.BlockSpec(w1.shape, lambda i: (0, 0)),
            pl.BlockSpec(b1.shape, lambda i: (0, 0)),
            pl.BlockSpec(w2.shape, lambda i: (0, 0)),
            pl.BlockSpec(b2.shape, lambda i: (0, 0)),
            pl.BlockSpec(w3.shape, lambda i: (0, 0)),
            pl.BlockSpec(b3.shape, lambda i: (0, 0)),
        ],
        # Narrow output block: last dim == full array dim (2), so this is a
        # legal block shape; writeback is 8 B/row of real data only.
        out_specs=pl.BlockSpec((TM, out_dim), lambda i: (i, 0)),
        compiler_params=pltpu.CompilerParams(
            dimension_semantics=("parallel",)),
    )(x, w1, b1, w2, b2, w3, b3)

    return out[:B]


def init_params(key, input_size):
    """Deterministic init mimicking nn.Linear's uniform(-1/sqrt(fan_in), 1/sqrt(fan_in)).
    Weights stored transposed as (in, out); biases as (1, out) for 2D TPU layout."""
    dims = [(input_size, 64), (64, 32), (32, 2)]
    params = {}
    for i, (fan_in, fan_out) in enumerate(dims, start=1):
        key, kw, kb = jax.random.split(key, 3)
        bound = 1.0 / jnp.sqrt(jnp.float32(fan_in))
        params[f"w{i}"] = jax.random.uniform(
            kw, (fan_in, fan_out), jnp.float32, minval=-bound, maxval=bound)
        params[f"b{i}"] = jax.random.uniform(
            kb, (1, fan_out), jnp.float32, minval=-bound, maxval=bound)
    return params


def _reference(x, params):
    h1 = jnp.maximum(x @ params["w1"] + params["b1"], 0.0)
    h2 = jnp.maximum(h1 @ params["w2"] + params["b2"], 0.0)
    return h2 @ params["w3"] + params["b3"]


if __name__ == "__main__":
    key = jax.random.PRNGKey(0)
    input_size = 32

    k_x, k_p, k_x2 = jax.random.split(key, 3)
    params = init_params(k_p, input_size)

    # Small-batch case (single grid step, TM shrunk to 8 sublanes).
    x_small = jax.random.normal(k_x, (8, input_size), dtype=jnp.float32)
    out_small = trading_nn_forward(x_small, params)
    jax.block_until_ready(out_small)
    assert out_small.shape == (8, 2)
    assert jnp.allclose(out_small, _reference(x_small, params), atol=1e-5, rtol=1e-5)

    # Larger batch exercising multi-step grid tiling + tail padding + the
    # "at least 2 grid steps" split (also checks a non-128-multiple TM path).
    x_big = jax.random.normal(k_x2, (300, input_size), dtype=jnp.float32)
    out_big = trading_nn_forward(x_big, params, tm=1024)
    jax.block_until_ready(out_big)
    assert out_big.shape == (300, 2)
    assert jnp.allclose(out_big, _reference(x_big, params), atol=1e-5, rtol=1e-5)

    # Non-multiple-of-8 user tm must not break lowering (rounded to sublanes).
    out_odd = trading_nn_forward(x_big, params, tm=100)
    jax.block_until_ready(out_odd)
    assert jnp.allclose(out_odd, _reference(x_big, params), atol=1e-5, rtol=1e-5)

    print("KERNEL_OK")
</pallas_src>

<mosaic_0001>
module attributes {stable_mosaic.version = 11 : i64} {
  func.func @_mlp_kernel(%arg0: i32, %arg1: memref<8x32xf32, #tpu.memory_space<vmem>>, %arg2: memref<32x64xf32, #tpu.memory_space<vmem>>, %arg3: memref<1x64xf32, #tpu.memory_space<vmem>>, %arg4: memref<64x32xf32, #tpu.memory_space<vmem>>, %arg5: memref<1x32xf32, #tpu.memory_space<vmem>>, %arg6: memref<32x2xf32, #tpu.memory_space<vmem>>, %arg7: memref<1x2xf32, #tpu.memory_space<vmem>>, %arg8: memref<8x2xf32, #tpu.memory_space<vmem>>) attributes {dimension_semantics = [#tpu.dimension_semantics<parallel>], iteration_bounds = array<i64: 1>, scalar_prefetch = 0 : i64, scratch_operands = 0 : i64, tpu.core_type = #tpu.core_type<tc>, window_params = [{transform_indices = @transform_0, window_bounds = array<i64: 8, 32>}, {pipeline_mode = #tpu.pipeline_mode<synchronous>, transform_indices = @transform_1, window_bounds = array<i64: 32, 64>}, {pipeline_mode = #tpu.pipeline_mode<synchronous>, transform_indices = @transform_2, window_bounds = array<i64: 1, 64>}, {pipeline_mode = #tpu.pipeline_mode<synchronous>, transform_indices = @transform_3, window_bounds = array<i64: 64, 32>}, {pipeline_mode = #tpu.pipeline_mode<synchronous>, transform_indices = @transform_4, window_bounds = array<i64: 1, 32>}, {pipeline_mode = #tpu.pipeline_mode<synchronous>, transform_indices = @transform_5, window_bounds = array<i64: 32, 2>}, {pipeline_mode = #tpu.pipeline_mode<synchronous>, transform_indices = @transform_6, window_bounds = array<i64: 1, 2>}, {transform_indices = @transform_7, window_bounds = array<i64: 8, 2>}]} {
    %c0 = arith.constant 0 : index
    %c0_0 = arith.constant 0 : index
    %0 = vector.load %arg1[%c0, %c0_0] : memref<8x32xf32, #tpu.memory_space<vmem>>, vector<8x32xf32>
    %c0_1 = arith.constant 0 : index
    %c0_2 = arith.constant 0 : index
    %1 = vector.load %arg2[%c0_1, %c0_2] : memref<32x64xf32, #tpu.memory_space<vmem>>, vector<32x64xf32>
    %cst = arith.constant dense<0.000000e+00> : vector<8x64xf32>
    %2 = tpu.matmul %0, %1, %cst {dimension_numbers = #tpu.dot_dimension_numbers<[1], [0], [0], [1], [0, 0, 1, 1], [], []>} : vector<8x32xf32>, vector<32x64xf32>, vector<8x64xf32> -> vector<8x64xf32>
    %c0_3 = arith.constant 0 : index
    %c0_4 = arith.constant 0 : index
    %3 = vector.load %arg3[%c0_3, %c0_4] : memref<1x64xf32, #tpu.memory_space<vmem>>, vector<1x64xf32>
    %4 = vector.broadcast %3 : vector<1x64xf32> to vector<8x64xf32>
    %5 = arith.addf %2, %4 : vector<8x64xf32>
    %cst_5 = arith.constant 0.000000e+00 : f32
    %6 = vector.broadcast %cst_5 : f32 to vector<8x64xf32>
    %7 = arith.maximumf %5, %6 : vector<8x64xf32>
    %c0_6 = arith.constant 0 : index
    %c0_7 = arith.constant 0 : index
    %8 = vector.load %arg4[%c0_6, %c0_7] : memref<64x32xf32, #tpu.memory_space<vmem>>, vector<64x32xf32>
    %cst_8 = arith.constant dense<0.000000e+00> : vector<8x32xf32>
    %9 = tpu.matmul %7, %8, %cst_8 {dimension_numbers = #tpu.dot_dimension_numbers<[1], [0], [0], [1], [0, 0, 1, 1], [], []>} : vector<8x64xf32>, vector<64x32xf32>, vector<8x32xf32> -> vector<8x32xf32>
    %c0_9 = arith.constant 0 : index
    %c0_10 = arith.constant 0 : index
    %10 = vector.load %arg5[%c0_9, %c0_10] : memref<1x32xf32, #tpu.memory_space<vmem>>, vector<1x32xf32>
    %11 = vector.broadcast %10 : vector<1x32xf32> to vector<8x32xf32>
    %12 = arith.addf %9, %11 : vector<8x32xf32>
    %cst_11 = arith.constant 0.000000e+00 : f32
    %13 = vector.broadcast %cst_11 : f32 to vector<8x32xf32>
    %14 = arith.maximumf %12, %13 : vector<8x32xf32>
    %c0_12 = arith.constant 0 : index
    %c0_13 = arith.constant 0 : index
    %15 = vector.load %arg6[%c0_12, %c0_13] : memref<32x2xf32, #tpu.memory_space<vmem>>, vector<32x2xf32>
    %cst_14 = arith.constant dense<0.000000e+00> : vector<8x2xf32>
    %16 = tpu.matmul %14, %15, %cst_14 {dimension_numbers = #tpu.dot_dimension_numbers<[1], [0], [0], [1], [0, 0, 1, 1], [], []>} : vector<8x32xf32>, vector<32x2xf32>, vector<8x2xf32> -> vector<8x2xf32>
    %c0_15 = arith.constant 0 : index
    %c0_16 = arith.constant 0 : index
    %17 = vector.load %arg7[%c0_15, %c0_16] : memref<1x2xf32, #tpu.memory_space<vmem>>, vector<1x2xf32>
    %18 = vector.broadcast %17 : vector<1x2xf32> to vector<8x2xf32>
    %19 = arith.addf %16, %18 : vector<8x2xf32>
    %c0_17 = arith.constant 0 : index
    %c0_18 = arith.constant 0 : index
    %20 = vector.load %arg8[%c0_17, %c0_18] : memref<8x2xf32, #tpu.memory_space<vmem>>, vector<8x2xf32>
    tpu.vector_store %arg8[%c0_17, %c0_18], %19 {strides = array<i32>} : memref<8x2xf32, #tpu.memory_space<vmem>>, vector<8x2xf32>,
    return
  }
  func.func @transform_0(%arg0: i32) -> (i32, i32) {
    %c0_i32 = arith.constant 0 : i32
    %c0_i32_0 = arith.constant 0 : i32
    return %arg0, %c0_i32 : i32, i32
  }
  func.func @transform_1(%arg0: i32) -> (i32, i32) {
    %c0_i32 = arith.constant 0 : i32
    %c0_i32_0 = arith.constant 0 : i32
    %c0_i32_1 = arith.constant 0 : i32
    return %c0_i32, %c0_i32_0 : i32, i32
  }
  func.func @transform_2(%arg0: i32) -> (i32, i32) {
    %c0_i32 = arith.constant 0 : i32
    %c0_i32_0 = arith.constant 0 : i32
    %c0_i32_1 = arith.constant 0 : i32
    return %c0_i32, %c0_i32_0 : i32, i32
  }
  func.func @transform_3(%arg0: i32) -> (i32, i32) {
    %c0_i32 = arith.constant 0 : i32
    %c0_i32_0 = arith.constant 0 : i32
    %c0_i32_1 = arith.constant 0 : i32
    return %c0_i32, %c0_i32_0 : i32, i32
  }
  func.func @transform_4(%arg0: i32) -> (i32, i32) {
    %c0_i32 = arith.constant 0 : i32
    %c0_i32_0 = arith.constant 0 : i32
    %c0_i32_1 = arith.constant 0 : i32
    return %c0_i32, %c0_i32_0 : i32, i32
  }
  func.func @transform_5(%arg0: i32) -> (i32, i32) {
    %c0_i32 = arith.constant 0 : i32
    %c0_i32_0 = arith.constant 0 : i32
    %c0_i32_1 = arith.constant 0 : i32
    return %c0_i32, %c0_i32_0 : i32, i32
  }
  func.func @transform_6(%arg0: i32) -> (i32, i32) {
    %c0_i32 = arith.constant 0 : i32
    %c0_i32_0 = arith.constant 0 : i32
    %c0_i32_1 = arith.constant 0 : i32
    return %c0_i32, %c0_i32_0 : i32, i32
  }
  func.func @transform_7(%arg0: i32) -> (i32, i32) {
    %c0_i32 = arith.constant 0 : i32
    %c0_i32_0 = arith.constant 0 : i32
    return %arg0, %c0_i32 : i32, i32
  }
}

</mosaic_0001>

<bundles_post_ra>
// kernel: trading_nn_forward.1
= control target key start
LH: loop header
LB: loop body
LE: loop exit
PB: predicated region body
PF: predicated region fallthrough
CT: control target
= control target key end

     0   :  { %vm35_vm0 = vcmask 261120   ;;  %vm72_vm1 = vcmask 523264   ;;  %vm128_vm2 = vcmask 15360   ;;  %s245_s1 = inlined_call_operand.vmem [shape: f32[32,64], index: 1, kind: input, shape index: {}]   ;;  %s246_s3 = inlined_call_operand.vmem [shape: f32[64,32], index: 3, kind: input, shape index: {}]   ;;  %s247_s0 = inlined_call_operand.vmem [shape: f32[8,32], index: 0, kind: input, shape index: {}]   ;;  %s248_s2 = inlined_call_operand.vmem [shape: f32[1,64], index: 2, kind: input, shape index: {}]   ;;  %s249_s4 = inlined_call_operand.vmem [shape: f32[1,32], index: 4, kind: input, shape index: {}]   ;;  %s250_s5 = inlined_call_operand.vmem [shape: f32[32,2], index: 5, kind: input, shape index: {}]   ;;  %s251_s6 = inlined_call_operand.vmem [shape: f32[1,2], index: 6, kind: input, shape index: {}]   ;;  %s252_s7 = inlined_call_operand.vmem [shape: f32[8,2], index: 7, kind: output, shape index: {}]  }
   0x1   :  { %v30_v0 = vld [vmem:[%s245_s1 + $0x18] sm:$0xff]  ;;  %v29_v1 = vld [vmem:[%s245_s1 + $0x10] sm:$0xff]  ;;  %v28_v3 = vld [vmem:[%s245_s1 + $0x8] sm:$0xff] }
   0x2   :  { %51 = vmatpush.msra.mxu0 %v30_v0  ;;  %v67_v2 = vld [vmem:[%s246_s3 + $0x38] sm:$0xff]  ;;  %v66_v4 = vld [vmem:[%s246_s3 + $0x30] sm:$0xff]  ;;  %v65_v5 = vld [vmem:[%s246_s3 + $0x28] sm:$0xff] }
   0x3   :  { %84 = vmatpush.msra.mxu1 %v67_v2  ;;  %v27_v6 = vld [vmem:[%s245_s1] sm:$0xff]  ;;  %v63_v9 = vld [vmem:[%s246_s3 + $0x18] sm:$0xff]  ;;  %v62_v10 = vld [vmem:[%s246_s3 + $0x10] sm:$0xff] }
   0x4   :  { %52 = vmatpush.msra.mxu0 %v29_v1  ;;  %v26_v7 = vld [vmem:[%s247_s0] sm:$0xff]  ;;  %v61_v11 = vld [vmem:[%s246_s3 + $0x8] sm:$0xff]  ;;  %v100_v13 = vld [vmem:[%s250_s5 + $0x18] sm:$0xff] }
   0x5   :  { %85 = vmatpush.msra.mxu1 %v66_v4  ;;  %v64_v8 = vld [vmem:[%s246_s3 + $0x20] sm:$0xff]  ;;  %120 = vmatpush.msra.mxu2 %v100_v13  ;;  %v99_v18 = vld [vmem:[%s250_s5 + $0x10] sm:$0xff]  ;;  %v98_v19 = vld [vmem:[%s250_s5 + $0x8] sm:$0xff] }
   0x6   :  { %53 = vmatpush.msra.mxu0 %v28_v3  ;;  %v60_v12 = vld [vmem:[%s246_s3] sm:$0xff] }
   0x7   :  { %86 = vmatpush.msra.mxu1 %v65_v5  ;;  %v137_v14 = vld [vmem:[%s248_s2] ss:$0 sm:$0xff]  ;;  %121 = vmatpush.msra.mxu2 %v99_v18 }
   0x8   :  { %54 = vmatpush.msra.mxu0 %v27_v6  ;;  %v97_v20 = vld [vmem:[%s250_s5] sm:$0xff] }
   0x9   :  { %134 = vmatmul.msk.f32.vlgmr.msra.gmra.mxu0 %vm35_vm0, %v26_v7  ;;  %87 = vmatpush.msra.mxu1 %v64_v8  ;;  %v138_v21 = vld [vmem:[%s249_s4] ss:$0 sm:$0xff] }
   0xa   :  { %122 = vmatpush.msra.mxu2 %v98_v19  ;;  %v139_v25 = vld [vmem:[%s251_s6] ss:$0 sm:$0xff] }
   0xb   :  { %88 = vmatpush.msra.mxu1 %v63_v9 }
   0xc   :  { %123 = vmatpush.msra.mxu2 %v97_v20 }
   0xd   :  { %89 = vmatpush.msra.mxu1 %v62_v10 }
   0xf   :  { %90 = vmatpush.msra.mxu1 %v61_v11 }
  0x11   :  { %91 = vmatpush.msra.mxu1 %v60_v12 }
  0x86   :  { %v56_v15 = vpop.f32.mrf.mxu0 }
  0x87   :  { %v57_v16 = vadd.f32 %v137_v14, %v56_v15 }
  0x89   :  { %v59_v17 = vmax.f32 %v57_v16, 0.0 }
  0x8b   :  { %135 = vmatmul.msk.f32.vlgmr.msra.gmra.mxu1 %vm72_vm1, %v59_v17 }
 0x108   :  { %v93_v22 = vpop.f32.mrf.mxu1 }
 0x109   :  { %v94_v23 = vadd.f32 %v138_v21, %v93_v22 }
 0x10b   :  { %v96_v24 = vmax.f32 %v94_v23, 0.0 }
 0x10d   :  { %136 = vmatmul.msk.f32.vlgmr.msra.gmra.mxu2 %vm35_vm0, %v96_v24 }
 0x190   :  { %v125_v26 = vpop.f32.mrf.mxu2 }
 0x191   :  { %v126_v27 = vadd.f32 %v139_v25, %v125_v26 }
 0x193   :  { %129 = vst.msk [vmem:[%s252_s7] sm:$0xff] %vm128_vm2, %v126_v27 }

</bundles_post_ra>
